<compile_context>
chip_gen: v5e
topology: v5e:2x2
jax: 0.10.0
libtpu: 0.0.40
codegen_flags: <defaults>
</compile_context>

<pallas_src>
import functools

import jax
import jax.numpy as jnp
from jax.experimental import pallas as pl
from jax.experimental.pallas import tpu as pltpu

NUM_GROUPS = 32
EPS = 1e-6
_MIB = 1 << 20


def _pick_tile(n, prefs):
    for t in prefs:
        if t <= n and n % t == 0:
            return t
    return n  # full extent is always a legal block


# --------------------------------------------------------------------------- #
# Kernel 1: normalize-affine (precomputed scale/shift) + Q/K/V projections
# grid = (B, N/tn), block (1, tn, C)
# --------------------------------------------------------------------------- #
def _norm_qkv_kernel(x_ref, scale_ref, shift_ref,
                     wq_ref, wk_ref, wv_ref, bq_ref, bk_ref, bv_ref,
                     q_ref, k_ref, v_ref):
    # GroupNorm folded to an affine: h = x * scale + shift  (all f32, VPU)
    h = x_ref[0] * scale_ref[0] + shift_ref[0]            # [tn, C]
    h16 = h.astype(jnp.bfloat16)
    # Three MXU dots written directly into the output refs (no [tn,3C] temp).
    q_ref[0] = (jnp.dot(h16, wq_ref[...], preferred_element_type=jnp.float32)
                + bq_ref[...]).astype(q_ref.dtype)        # pre-scaled by C**-0.5
    k_ref[0] = (jnp.dot(h16, wk_ref[...], preferred_element_type=jnp.float32)
                + bk_ref[...]).astype(k_ref.dtype)
    v_ref[0] = (jnp.dot(h16, wv_ref[...], preferred_element_type=jnp.float32)
                + bv_ref[...]).astype(v_ref.dtype)


# --------------------------------------------------------------------------- #
# Kernel 2: attention with per-batch-resident K/V + output projection + residual
# grid = (B, N/tq); in-kernel fori_loop over key chunks of size tk (online softmax)
# --------------------------------------------------------------------------- #
def _attn_kernel(x_ref, q_ref, k_ref, v_ref, wp_ref, bp_ref, o_ref, *, tk):
    q = q_ref[0]                                           # [tq, C] bf16 (pre-scaled)
    tq, c = q.shape
    n = k_ref.shape[1]
    nk = n // tk

    def body(i, carry):
        m, l, acc = carry
        off = pl.multiple_of(i * tk, tk)
        k = k_ref[0, pl.ds(off, tk), :]                    # [tk, C] bf16 (from VMEM)
        v = v_ref[0, pl.ds(off, tk), :]                    # [tk, C] bf16
        # scores: contract last dims directly (no explicit transpose)
        s = jax.lax.dot_general(q, k, (((1,), (1,)), ((), ())),
                                preferred_element_type=jnp.float32)     # [tq, tk]
        m_new = jnp.maximum(m, jnp.max(s, axis=-1, keepdims=True))
        alpha = jnp.exp(m - m_new)
        p = jnp.exp(s - m_new)                                          # [tq, tk]
        l = alpha * l + jnp.sum(p, axis=-1, keepdims=True)
        acc = alpha * acc + jnp.dot(p.astype(jnp.bfloat16), v,
                                    preferred_element_type=jnp.float32)  # [tq, C]
        return m_new, l, acc

    m0 = jnp.full((tq, 1), -jnp.inf, dtype=jnp.float32)
    l0 = jnp.zeros((tq, 1), dtype=jnp.float32)
    a0 = jnp.zeros((tq, c), dtype=jnp.float32)
    _, l, acc = jax.lax.fori_loop(0, nk, body, (m0, l0, a0))

    ctx = acc / l                                          # exact reciprocal, runs once
    proj = jnp.dot(ctx.astype(jnp.bfloat16), wp_ref[...],
                   preferred_element_type=jnp.float32) + bp_ref[...]    # [tq, C]
    o_ref[0] = (x_ref[0] + proj).astype(o_ref.dtype)


def attn_block(x_nchw, params):
    """x_nchw: [B, C, H, W] float32. params: weights stored as [C_in, C_out]."""
    b, c, h, w = x_nchw.shape
    n = h * w
    assert c % NUM_GROUPS == 0, "GroupNorm(32) requires channels divisible by 32"
    cg = c // NUM_GROUPS

    # Glue: NCHW -> [B, N, C] (channels on the lane axis).
    # TODO(synk): fold the NCHW<->[B,N,C] transposes into the kernels to save one
    # full HBM round-trip of the activation in each direction.
    x = jnp.transpose(x_nchw.reshape(b, c, n), (0, 2, 1)).astype(jnp.float32)

    # --- exact-f32 group statistics (tiny XLA reduce), folded with gamma/beta ---
    xg = x.reshape(b, n, NUM_GROUPS, cg)
    g_mean = jnp.mean(xg, axis=(1, 3))                                     # [B, 32]
    g_var = jnp.mean(jnp.square(xg - g_mean[:, None, :, None]), axis=(1, 3))
    inv_std = jax.lax.rsqrt(g_var + EPS)                                   # [B, 32]
    gamma = params["gamma"].astype(jnp.float32)
    beta = params["beta"].astype(jnp.float32)
    scale = jnp.repeat(inv_std, cg, axis=1) * gamma[None, :]               # [B, C]
    shift = beta[None, :] - jnp.repeat(g_mean, cg, axis=1) * scale         # [B, C]
    scale = scale[:, None, :]                                              # [B, 1, C]
    shift = shift[:, None, :]

    # Weights (bf16 for MXU), attention scale folded into the q projection.
    attn_scale = jnp.float32(int(c) ** (-0.5))
    wq = (params["wq"] * attn_scale).astype(jnp.bfloat16)
    wk = params["wk"].astype(jnp.bfloat16)
    wv = params["wv"].astype(jnp.bfloat16)
    bq = (params["bq"] * attn_scale)[None, :].astype(jnp.float32)
    bk = params["bk"][None, :].astype(jnp.float32)
    bv = params["bv"][None, :].astype(jnp.float32)
    wp = params["wp"].astype(jnp.bfloat16)
    bp = params["bp"][None, :].astype(jnp.float32)

    # ---- kernel 1: normalize + QKV, tiled over the spatial axis -------------
    tn = _pick_tile(n, (512, 256, 128, 64, 32, 16, 8))
    wcc = pl.BlockSpec((c, c), lambda bi, ni: (0, 0))
    b1c = pl.BlockSpec((1, c), lambda bi, ni: (0, 0))
    k1_vmem = int(2 * (tn * c * 4 + 3 * tn * c * 2)       # x in + 3 outs (double-buffered)
                  + 2 * (3 * c * c * 2 + 3 * c * 4)       # weights + biases
                  + 2 * 2 * c * 4                         # scale/shift
                  + 4 * tn * c * 4)                       # temporaries headroom
    q, k, v = pl.pallas_call(
        _norm_qkv_kernel,
        out_shape=(jax.ShapeDtypeStruct((b, n, c), jnp.bfloat16),) * 3,
        grid_spec=pltpu.PrefetchScalarGridSpec(
            num_scalar_prefetch=0,
            grid=(b, n // tn),
            in_specs=[
                pl.BlockSpec((1, tn, c), lambda bi, ni: (bi, ni, 0)),   # x
                pl.BlockSpec((1, 1, c), lambda bi, ni: (bi, 0, 0)),     # scale
                pl.BlockSpec((1, 1, c), lambda bi, ni: (bi, 0, 0)),     # shift
                wcc, wcc, wcc,                                          # Wq, Wk, Wv
                b1c, b1c, b1c,                                          # bq, bk, bv
            ],
            out_specs=[pl.BlockSpec((1, tn, c), lambda bi, ni: (bi, ni, 0))] * 3,
        ),
        compiler_params=pltpu.CompilerParams(
            dimension_semantics=("parallel", "parallel"),
            vmem_limit_bytes=int(min(max(k1_vmem, 32 * _MIB), 64 * _MIB))),
    )(x, scale, shift, wq, wk, wv, bq, bk, bv)

    # ---- kernel 2: attention (resident K/V) + projection + residual ---------
    tq = _pick_tile(n, (512, 256, 128, 64, 32, 16, 8))
    tk = _pick_tile(n, (256, 128, 64, 32, 16, 8))
    k2_vmem = int(2 * 2 * (n * c * 2)                          # K + V resident (double-buffered)
                  + 2 * (tq * c * 4 + tq * c * 2 + tq * c * 4) # x, q, out (double-buffered)
                  + 2 * (c * c * 2 + c * 4)                    # Wproj, bproj
                  + 2 * tq * c * 4 + 4 * tq * tk * 4)          # acc + score temporaries
    # TODO(synk): for very large N (resident K/V no longer fits ~40 MiB, e.g. v7x at
    # N>~12K, C=512) fall back to a streamed (B, nq, nk) grid with larger tq.
    out = pl.pallas_call(
        functools.partial(_attn_kernel, tk=tk),
        out_shape=jax.ShapeDtypeStruct((b, n, c), jnp.float32),
        grid_spec=pltpu.PrefetchScalarGridSpec(
            num_scalar_prefetch=0,
            grid=(b, n // tq),
            in_specs=[
                pl.BlockSpec((1, tq, c), lambda bi, qi: (bi, qi, 0)),   # x (residual)
                pl.BlockSpec((1, tq, c), lambda bi, qi: (bi, qi, 0)),   # q
                pl.BlockSpec((1, n, c), lambda bi, qi: (bi, 0, 0)),     # k: resident per batch
                pl.BlockSpec((1, n, c), lambda bi, qi: (bi, 0, 0)),     # v: resident per batch
                pl.BlockSpec((c, c), lambda bi, qi: (0, 0)),            # Wproj
                pl.BlockSpec((1, c), lambda bi, qi: (0, 0)),            # bproj
            ],
            out_specs=pl.BlockSpec((1, tq, c), lambda bi, qi: (bi, qi, 0)),
        ),
        compiler_params=pltpu.CompilerParams(
            dimension_semantics=("parallel", "parallel"),
            vmem_limit_bytes=int(min(max(k2_vmem, 32 * _MIB), 64 * _MIB))),
    )(x, q, k, v, wp, bp)

    # Glue back: [B, N, C] -> NCHW
    return jnp.transpose(out, (0, 2, 1)).reshape(b, c, h, w)


def _reference(x_nchw, params):
    """Pure-JAX f32 reference mirroring the PyTorch forward (NCHW)."""
    b, c, h, w = x_nchw.shape
    n = h * w
    cg = c // NUM_GROUPS
    xf = x_nchw.astype(jnp.float32)

    xg = xf.reshape(b, NUM_GROUPS, cg * n)
    mean = jnp.mean(xg, axis=-1, keepdims=True)
    var = jnp.mean((xg - mean) ** 2, axis=-1, keepdims=True)
    hn = ((xg - mean) / jnp.sqrt(var + EPS)).reshape(b, c, h, w)
    hn = hn * params["gamma"][None, :, None, None] + params["beta"][None, :, None, None]

    def conv1x1(t, w_io, bias):  # weight stored as [C_in, C_out]
        return jnp.einsum("bchw,cd->bdhw", t, w_io) + bias[None, :, None, None]

    q = conv1x1(hn, params["wq"], params["bq"]).reshape(b, c, n).transpose(0, 2, 1)
    k = conv1x1(hn, params["wk"], params["bk"]).reshape(b, c, n)
    v = conv1x1(hn, params["wv"], params["bv"]).reshape(b, c, n)

    w_ = jnp.einsum("bic,bcj->bij", q, k) * (int(c) ** (-0.5))
    w_ = jax.nn.softmax(w_, axis=2)
    h_ = jnp.einsum("bcj,bij->bci", v, w_).reshape(b, c, h, w)
    h_ = conv1x1(h_, params["wp"], params["bp"])
    return xf + h_


if __name__ == "__main__":
    B, C, H, W = 2, 64, 8, 8
    key = jax.random.PRNGKey(0)
    ks = jax.random.split(key, 10)

    x = jax.random.normal(ks[0], (B, C, H, W), dtype=jnp.float32)

    def init_w(k):
        return jax.random.normal(k, (C, C), dtype=jnp.float32) * (1.0 / jnp.sqrt(C))

    params = {
        "gamma": 1.0 + 0.1 * jax.random.normal(ks[1], (C,), dtype=jnp.float32),
        "beta": 0.1 * jax.random.normal(ks[2], (C,), dtype=jnp.float32),
        "wq": init_w(ks[3]), "bq": 0.05 * jax.random.normal(ks[4], (C,), dtype=jnp.float32),
        "wk": init_w(ks[5]), "bk": 0.05 * jax.random.normal(ks[6], (C,), dtype=jnp.float32),
        "wv": init_w(ks[7]), "bv": 0.05 * jax.random.normal(ks[8], (C,), dtype=jnp.float32),
        "wp": init_w(ks[9]), "bp": jnp.zeros((C,), dtype=jnp.float32),
    }

    out = jax.block_until_ready(attn_block(x, params))
    ref = jax.block_until_ready(_reference(x, params))

    assert out.shape == (B, C, H, W)
    max_err = float(jnp.max(jnp.abs(out - ref)))
    # Remaining error comes only from bf16 MXU operands (q/k/v, probs, weights) with
    # f32 accumulation; group stats and softmax normalization are now exact f32.
    assert jnp.allclose(out, ref, atol=5e-2, rtol=5e-2), max_err
    print("KERNEL_OK")
</pallas_src>

<mosaic_0001>
module attributes {stable_mosaic.version = 11 : i64} {
  func.func @_norm_qkv_kernel(%arg0: i32, %arg1: i32, %arg2: memref<1x64x64xf32, #tpu.memory_space<vmem>>, %arg3: memref<1x1x64xf32, #tpu.memory_space<vmem>>, %arg4: memref<1x1x64xf32, #tpu.memory_space<vmem>>, %arg5: memref<64x64xbf16, #tpu.memory_space<vmem>>, %arg6: memref<64x64xbf16, #tpu.memory_space<vmem>>, %arg7: memref<64x64xbf16, #tpu.memory_space<vmem>>, %arg8: memref<1x64xf32, #tpu.memory_space<vmem>>, %arg9: memref<1x64xf32, #tpu.memory_space<vmem>>, %arg10: memref<1x64xf32, #tpu.memory_space<vmem>>, %arg11: memref<1x64x64xbf16, #tpu.memory_space<vmem>>, %arg12: memref<1x64x64xbf16, #tpu.memory_space<vmem>>, %arg13: memref<1x64x64xbf16, #tpu.memory_space<vmem>>) attributes {dimension_semantics = [#tpu.dimension_semantics<parallel>, #tpu.dimension_semantics<parallel>], iteration_bounds = array<i64: 2, 1>, scalar_prefetch = 0 : i64, scratch_operands = 0 : i64, tpu.core_type = #tpu.core_type<tc>, window_params = [{transform_indices = @transform_0, window_bounds = array<i64: 1, 64, 64>}, {transform_indices = @transform_1, window_bounds = array<i64: 1, 1, 64>}, {transform_indices = @transform_2, window_bounds = array<i64: 1, 1, 64>}, {pipeline_mode = #tpu.pipeline_mode<synchronous>, transform_indices = @transform_3, window_bounds = array<i64: 64, 64>}, {pipeline_mode = #tpu.pipeline_mode<synchronous>, transform_indices = @transform_4, window_bounds = array<i64: 64, 64>}, {pipeline_mode = #tpu.pipeline_mode<synchronous>, transform_indices = @transform_5, window_bounds = array<i64: 64, 64>}, {pipeline_mode = #tpu.pipeline_mode<synchronous>, transform_indices = @transform_6, window_bounds = array<i64: 1, 64>}, {pipeline_mode = #tpu.pipeline_mode<synchronous>, transform_indices = @transform_7, window_bounds = array<i64: 1, 64>}, {pipeline_mode = #tpu.pipeline_mode<synchronous>, transform_indices = @transform_8, window_bounds = array<i64: 1, 64>}, {transform_indices = @transform_9, window_bounds = array<i64: 1, 64, 64>}, {transform_indices = @transform_10, window_bounds = array<i64: 1, 64, 64>}, {transform_indices = @transform_11, window_bounds = array<i64: 1, 64, 64>}]} {
    %c0 = arith.constant 0 : index
    %c0_0 = arith.constant 0 : index
    %c0_1 = arith.constant 0 : index
    %0 = vector.load %arg2[%c0, %c0_0, %c0_1] : memref<1x64x64xf32, #tpu.memory_space<vmem>>, vector<1x64x64xf32>
    %1 = vector.shape_cast %0 : vector<1x64x64xf32> to vector<64x64xf32>
    %c0_2 = arith.constant 0 : index
    %c0_3 = arith.constant 0 : index
    %c0_4 = arith.constant 0 : index
    %2 = vector.load %arg3[%c0_2, %c0_3, %c0_4] : memref<1x1x64xf32, #tpu.memory_space<vmem>>, vector<1x1x64xf32>
    %3 = vector.shape_cast %2 : vector<1x1x64xf32> to vector<1x64xf32>
    %4 = vector.broadcast %3 : vector<1x64xf32> to vector<64x64xf32>
    %5 = arith.mulf %1, %4 : vector<64x64xf32>
    %c0_5 = arith.constant 0 : index
    %c0_6 = arith.constant 0 : index
    %c0_7 = arith.constant 0 : index
    %6 = vector.load %arg4[%c0_5, %c0_6, %c0_7] : memref<1x1x64xf32, #tpu.memory_space<vmem>>, vector<1x1x64xf32>
    %7 = vector.shape_cast %6 : vector<1x1x64xf32> to vector<1x64xf32>
    %8 = vector.broadcast %7 : vector<1x64xf32> to vector<64x64xf32>
    %9 = arith.addf %5, %8 : vector<64x64xf32>
    %10 = arith.truncf %9 : vector<64x64xf32> to vector<64x64xbf16>
    %c0_8 = arith.constant 0 : index
    %c0_9 = arith.constant 0 : index
    %11 = vector.load %arg5[%c0_8, %c0_9] : memref<64x64xbf16, #tpu.memory_space<vmem>>, vector<64x64xbf16>
    %cst = arith.constant dense<0.000000e+00> : vector<64x64xf32>
    %12 = tpu.matmul %10, %11, %cst {dimension_numbers = #tpu.dot_dimension_numbers<[1], [0], [0], [1], [0, 0, 1, 1], [], []>} : vector<64x64xbf16>, vector<64x64xbf16>, vector<64x64xf32> -> vector<64x64xf32>
    %c0_10 = arith.constant 0 : index
    %c0_11 = arith.constant 0 : index
    %13 = vector.load %arg8[%c0_10, %c0_11] : memref<1x64xf32, #tpu.memory_space<vmem>>, vector<1x64xf32>
    %14 = vector.broadcast %13 : vector<1x64xf32> to vector<64x64xf32>
    %15 = arith.addf %12, %14 : vector<64x64xf32>
    %16 = arith.truncf %15 : vector<64x64xf32> to vector<64x64xbf16>
    %c0_12 = arith.constant 0 : index
    %c0_13 = arith.constant 0 : index
    %c0_14 = arith.constant 0 : index
    %17 = vector.load %arg11[%c0_12, %c0_13, %c0_14] : memref<1x64x64xbf16, #tpu.memory_space<vmem>>, vector<1x64x64xbf16>
    %18 = vector.shape_cast %17 : vector<1x64x64xbf16> to vector<64x64xbf16>
    %19 = vector.shape_cast %16 : vector<64x64xbf16> to vector<1x64x64xbf16>
    tpu.vector_store %arg11[%c0_12, %c0_13, %c0_14], %19 {strides = array<i32>} : memref<1x64x64xbf16, #tpu.memory_space<vmem>>, vector<1x64x64xbf16>,
    %c0_15 = arith.constant 0 : index
    %c0_16 = arith.constant 0 : index
    %20 = vector.load %arg6[%c0_15, %c0_16] : memref<64x64xbf16, #tpu.memory_space<vmem>>, vector<64x64xbf16>
    %cst_17 = arith.constant dense<0.000000e+00> : vector<64x64xf32>
    %21 = tpu.matmul %10, %20, %cst_17 {dimension_numbers = #tpu.dot_dimension_numbers<[1], [0], [0], [1], [0, 0, 1, 1], [], []>} : vector<64x64xbf16>, vector<64x64xbf16>, vector<64x64xf32> -> vector<64x64xf32>
    %c0_18 = arith.constant 0 : index
    %c0_19 = arith.constant 0 : index
    %22 = vector.load %arg9[%c0_18, %c0_19] : memref<1x64xf32, #tpu.memory_space<vmem>>, vector<1x64xf32>
    %23 = vector.broadcast %22 : vector<1x64xf32> to vector<64x64xf32>
    %24 = arith.addf %21, %23 : vector<64x64xf32>
    %25 = arith.truncf %24 : vector<64x64xf32> to vector<64x64xbf16>
    %c0_20 = arith.constant 0 : index
    %c0_21 = arith.constant 0 : index
    %c0_22 = arith.constant 0 : index
    %26 = vector.load %arg12[%c0_20, %c0_21, %c0_22] : memref<1x64x64xbf16, #tpu.memory_space<vmem>>, vector<1x64x64xbf16>
    %27 = vector.shape_cast %26 : vector<1x64x64xbf16> to vector<64x64xbf16>
    %28 = vector.shape_cast %25 : vector<64x64xbf16> to vector<1x64x64xbf16>
    tpu.vector_store %arg12[%c0_20, %c0_21, %c0_22], %28 {strides = array<i32>} : memref<1x64x64xbf16, #tpu.memory_space<vmem>>, vector<1x64x64xbf16>,
    %c0_23 = arith.constant 0 : index
    %c0_24 = arith.constant 0 : index
    %29 = vector.load %arg7[%c0_23, %c0_24] : memref<64x64xbf16, #tpu.memory_space<vmem>>, vector<64x64xbf16>
    %cst_25 = arith.constant dense<0.000000e+00> : vector<64x64xf32>
    %30 = tpu.matmul %10, %29, %cst_25 {dimension_numbers = #tpu.dot_dimension_numbers<[1], [0], [0], [1], [0, 0, 1, 1], [], []>} : vector<64x64xbf16>, vector<64x64xbf16>, vector<64x64xf32> -> vector<64x64xf32>
    %c0_26 = arith.constant 0 : index
    %c0_27 = arith.constant 0 : index
    %31 = vector.load %arg10[%c0_26, %c0_27] : memref<1x64xf32, #tpu.memory_space<vmem>>, vector<1x64xf32>
    %32 = vector.broadcast %31 : vector<1x64xf32> to vector<64x64xf32>
    %33 = arith.addf %30, %32 : vector<64x64xf32>
    %34 = arith.truncf %33 : vector<64x64xf32> to vector<64x64xbf16>
    %c0_28 = arith.constant 0 : index
    %c0_29 = arith.constant 0 : index
    %c0_30 = arith.constant 0 : index
    %35 = vector.load %arg13[%c0_28, %c0_29, %c0_30] : memref<1x64x64xbf16, #tpu.memory_space<vmem>>, vector<1x64x64xbf16>
    %36 = vector.shape_cast %35 : vector<1x64x64xbf16> to vector<64x64xbf16>
    %37 = vector.shape_cast %34 : vector<64x64xbf16> to vector<1x64x64xbf16>
    tpu.vector_store %arg13[%c0_28, %c0_29, %c0_30], %37 {strides = array<i32>} : memref<1x64x64xbf16, #tpu.memory_space<vmem>>, vector<1x64x64xbf16>,
    return
  }
  func.func @transform_0(%arg0: i32, %arg1: i32) -> (i32, i32, i32) {
    %c0_i32 = arith.constant 0 : i32
    %c0_i32_0 = arith.constant 0 : i32
    return %arg0, %arg1, %c0_i32 : i32, i32, i32
  }
  func.func @transform_1(%arg0: i32, %arg1: i32) -> (i32, i32, i32) {
    %c0_i32 = arith.constant 0 : i32
    %c0_i32_0 = arith.constant 0 : i32
    %c0_i32_1 = arith.constant 0 : i32
    return %arg0, %c0_i32, %c0_i32_0 : i32, i32, i32
  }
  func.func @transform_2(%arg0: i32, %arg1: i32) -> (i32, i32, i32) {
    %c0_i32 = arith.constant 0 : i32
    %c0_i32_0 = arith.constant 0 : i32
    %c0_i32_1 = arith.constant 0 : i32
    return %arg0, %c0_i32, %c0_i32_0 : i32, i32, i32
  }
  func.func @transform_3(%arg0: i32, %arg1: i32) -> (i32, i32) {
    %c0_i32 = arith.constant 0 : i32
    %c0_i32_0 = arith.constant 0 : i32
    %c0_i32_1 = arith.constant 0 : i32
    return %c0_i32, %c0_i32_0 : i32, i32
  }
  func.func @transform_4(%arg0: i32, %arg1: i32) -> (i32, i32) {
    %c0_i32 = arith.constant 0 : i32
    %c0_i32_0 = arith.constant 0 : i32
    %c0_i32_1 = arith.constant 0 : i32
    return %c0_i32, %c0_i32_0 : i32, i32
  }
  func.func @transform_5(%arg0: i32, %arg1: i32) -> (i32, i32) {
    %c0_i32 = arith.constant 0 : i32
    %c0_i32_0 = arith.constant 0 : i32
    %c0_i32_1 = arith.constant 0 : i32
    return %c0_i32, %c0_i32_0 : i32, i32
  }
  func.func @transform_6(%arg0: i32, %arg1: i32) -> (i32, i32) {
    %c0_i32 = arith.constant 0 : i32
    %c0_i32_0 = arith.constant 0 : i32
    %c0_i32_1 = arith.constant 0 : i32
    return %c0_i32, %c0_i32_0 : i32, i32
  }
  func.func @transform_7(%arg0: i32, %arg1: i32) -> (i32, i32) {
    %c0_i32 = arith.constant 0 : i32
    %c0_i32_0 = arith.constant 0 : i32
    %c0_i32_1 = arith.constant 0 : i32
    return %c0_i32, %c0_i32_0 : i32, i32
  }
  func.func @transform_8(%arg0: i32, %arg1: i32) -> (i32, i32) {
    %c0_i32 = arith.constant 0 : i32
    %c0_i32_0 = arith.constant 0 : i32
    %c0_i32_1 = arith.constant 0 : i32
    return %c0_i32, %c0_i32_0 : i32, i32
  }
  func.func @transform_9(%arg0: i32, %arg1: i32) -> (i32, i32, i32) {
    %c0_i32 = arith.constant 0 : i32
    %c0_i32_0 = arith.constant 0 : i32
    return %arg0, %arg1, %c0_i32 : i32, i32, i32
  }
  func.func @transform_10(%arg0: i32, %arg1: i32) -> (i32, i32, i32) {
    %c0_i32 = arith.constant 0 : i32
    %c0_i32_0 = arith.constant 0 : i32
    return %arg0, %arg1, %c0_i32 : i32, i32, i32
  }
  func.func @transform_11(%arg0: i32, %arg1: i32) -> (i32, i32, i32) {
    %c0_i32 = arith.constant 0 : i32
    %c0_i32_0 = arith.constant 0 : i32
    return %arg0, %arg1, %c0_i32 : i32, i32, i32
  }
}

</mosaic_0001>

<bundles_post_ra>
// kernel: tpu_custom_call.1
= control target key start
LH: loop header
LB: loop body
LE: loop exit
PB: predicated region body
PF: predicated region fallthrough
CT: control target
= control target key end

     0   :  { %s2186_s0 = inlined_call_operand.hbm [shape: f32[2,64,64], index: 0, kind: input, shape index: {}]   ;;  %s2187_s1 = inlined_call_operand.hbm [shape: f32[2,1,64], index: 1, kind: input, shape index: {}]   ;;  %s2188_s2 = inlined_call_operand.hbm [shape: f32[2,1,64], index: 2, kind: input, shape index: {}]   ;;  %s2189_s3 = inlined_call_operand.hbm [shape: bf16[64,64], index: 3, kind: input, shape index: {}]   ;;  %s2190_s4 = inlined_call_operand.hbm [shape: bf16[64,64], index: 4, kind: input, shape index: {}]   ;;  %s2191_s5 = inlined_call_operand.hbm [shape: bf16[64,64], index: 5, kind: input, shape index: {}]   ;;  %s2192_s6 = inlined_call_operand.vmem [shape: f32[1,64], index: 6, kind: input, shape index: {}]   ;;  %s2193_s7 = inlined_call_operand.vmem [shape: f32[1,64], index: 7, kind: input, shape index: {}]   ;;  %s2194_s8 = inlined_call_operand.vmem [shape: f32[1,64], index: 8, kind: input, shape index: {}]   ;;  %s2195_s9 = inlined_call_operand.hbm [shape: bf16[2,64,64], index: 9, kind: output, shape index: {0}]   ;;  %s2196_s10 = inlined_call_operand.hbm [shape: bf16[2,64,64], index: 10, kind: output, shape index: {1}]   ;;  %s2197_s11 = inlined_call_operand.hbm [shape: bf16[2,64,64], index: 11, kind: output, shape index: {2}]  }
   0x1   :  { %2214 = sst [smem:[#allocation30_spill]] %s2187_s1 }
   0x2   :  { %2215 = sst [smem:[#allocation31_spill]] %s2189_s3 }
   0x3   :  { %2216 = sst [smem:[#allocation32_spill]] %s2190_s4 }
   0x4   :  { %2217 = sst [smem:[#allocation33_spill]] %s2191_s5 }
   0x5   :  { %2218 = sst [smem:[#allocation34_spill]] %s2195_s9 }
   0x6   :  { %2219 = sst [smem:[#allocation35_spill]] %s2196_s10 }
   0x7   :  { %2220 = sst [smem:[#allocation36_spill]] %s2197_s11 }
   0x8   :  { %17 = vsyncpa [#allocation3], 0 }
   0x9   :  { %19 = vsyncpa [#allocation3 + $0x1], 0 }
   0xa   :  { %20 = vsyncpa [#allocation6], 0 }
   0xb   :  { %22 = vsyncpa [#allocation6 + $0x1], 0 }
   0xc   :  { %23 = vsyncpa [#allocation9], 0 }
   0xd   :  { %24 = vsyncpa [#allocation12], 0 }
   0xe   :  { %25 = vsyncpa [#allocation4], 0 }
   0xf   :  { %27 = vsyncpa [#allocation4 + $0x1], 0 }
  0x10   :  { %28 = vsyncpa [#allocation15], 0 }
  0x11   :  { %30 = vsyncpa [#allocation15 + $0x1], 0  ;;  %s1794_s17 = smov 0   ;;  %s1796_s18 = smov 0  }
  0x12   :  { %s1798_s19 = smov 0   ;;  %s1800_s20 = smov 0  }
  0x13   :  { %s1802_s21 = smov 0   ;;  %s1804_s22 = smov 0  }
  0x14 LB: > { %2221 = sst [smem:[#allocation23_spill]] %s1703_s17  ;;  %s1825_s23 = sadd.s32 4294967295, %s1723_s22   ;;  %s1723_s22 = sphi %s1804_s22, %s36_s22   ;;  %s1719_s21 = sphi %s1802_s21, %s2255_s21   ;;  %s1715_s20 = sphi %s1800_s20, %s2254_s20   ;;  %s1711_s19 = sphi %s1798_s19, %s2250_s19   ;;  %s1707_s18 = sphi %s1796_s18, %s2253_s18   ;;  %s1703_s17 = sphi %s1794_s17, %s2252_s17  }
  0x15   : > { %2222 = sst [smem:[#allocation24_spill]] %s1711_s19  ;;  %p1150_p0 = scmp.ge.s32.totalorder %s1723_s22, 1 }
  0x16   : > { %2223 = sst [smem:[#allocation25_spill]] %s1723_s22  ;;  %p71_p1 = scmp.eq.s32.totalorder %s1825_s23, 0 }
  0x17   : > { %p343_p2 = scmp.lt.s32.totalorder %s1723_s22, 3  ;;  %s2224_s3 = sld [smem:[#allocation31_spill]] }
  0x18   : > { %s1725_s28 = smov [#allocation8]   ;;  %s2198_s12 = smov 64  }
  0x19   : > { %p1833_p3 = pnand %p1150_p0, %p343_p2  ;;  %s356_s29 = sshll.u32 %s1725_s28, 4  ;;  %s357_s29 = int_to_ptr.vmem [resolvable:$true] %s356_s29 }
  0x1a   : > { %s2200_s13 = smov 4   ;;  %s2202_s14 = sadd.s32 4294967294, %s1723_s22  }
  0x1b   : > { %p1289_p4 = pneg %p1833_p3  ;;  %s48_s15 = sadd.s32 1, %s1719_s21 }
  0x1c   : > { %s57_s16 = sadd.s32 1, %s1711_s19  ;;  %p50_p7 = scmp.ge.s32.totalorder %s48_s15, 2 }
  0x1d   : > { %s354_s26 = sshll.u32 %s2224_s3, 4  ;;  %p1841_p5 = pnand %p1289_p4, %p71_p1  ;;  %s355_s26 = int_to_ptr.hbm [resolvable:$true] %s354_s26 }
  0x1e   : > { %p64_p8 = scmp.ne.s32.totalorder %s1711_s19, %s1707_s18  ;;  %p65_p9 = scmp.eq.s32.totalorder %s1723_s22, 0 }
  0x1f   : > { %1292 = dma.hbm_to_vmem [thread:$0]  (!%p1841_p5), %s355_s26, 512, %s357_s29, [#allocation9], %s2198_s12, %s2198_s12, %s2200_s13  }
  0x20   : > { %p70_p10 = scmp.ne.s32.totalorder %s1707_s18, %s1703_s17  ;;  %s2257_s15 = smov (%p50_p7, %s48_s15), 0 }
  0x21   : > { %2227 = sst [smem:[#allocation26_spill]] %s2257_s15  ;;  %p66_p11 = por %p65_p9, %p64_p8 }
  0x22   : > { %p1863_p12 = por %p71_p1, %p70_p10  ;;  %s52_s25 = ssub.s32 %s1719_s21, %s2257_s15 }
  0x23   : > { %p274_p13 = scmp.eq.s32.totalorder %s1825_s23, 1  ;;  %p55_p0 = scmp.eq.s32.totalorder %s52_s25, 0 }
  0x24   : > { %p280_p2 = scmp.eq.s32.totalorder %s2202_s14, 1  ;;  %p1322_p6 = scmp.lt.s32.totalorder %s1723_s22, 2 }
  0x25   : > { %p1872_p4 = por %p274_p13, %p64_p8  ;;  %s1885_s12 = sand.u32 1, %s1711_s19  }
  0x26   : > { %s1878_s28 = scalar_select %p55_p0, %s1711_s19, %s57_s16  }
  0x27   : > { %s2229_s26 = scalar_select %p1872_p4, 1, 0 }
  0x28   : > { %2231 = sst [smem:[#allocation28_spill]] %s1878_s28  ;;  %p1880_p7 = por %p280_p2, %p70_p10 }
  0x29   : > { %2230 = sst [smem:[#allocation27_spill]] %s2229_s26  ;;  %p1887_p9 = pnand %p1322_p6, %p66_p11 }
  0x2a   : > { %s2232_s29 = scalar_select %p1880_p7, 1, 0 }
  0x2b   : > { %s431_s25 = sand.u32 1, %s1723_s22   ;;  %s2235_s1 = sld [smem:[#allocation30_spill]] }
  0x2c   : > { %2233 = sst [smem:[#allocation29_spill]] %s2232_s29  ;;  %s434_s28 = scalar_lea.vmem [#allocation5], %s1885_s12 }
  0x2d   : > { %s441_s17 = sshll.u32 %s434_s28, 4  ;;  %s1897_s19 = scalar_lea.sflag [#allocation6], %s431_s25  ;;  %s442_s17 = int_to_ptr.vmem [resolvable:$true] %s441_s17 }
  0x2e   : > { %s2236_s4 = sld [smem:[#allocation32_spill]]  ;;  %s1728_s3 = smov [#allocation10]  }
  0x2f   : > { %s370_s14 = sshll.u32 %s1728_s3, 4  ;;  %s2237_s5 = sld [smem:[#allocation33_spill]]  ;;  %s371_s14 = int_to_ptr.vmem [resolvable:$true] %s370_s14 }
  0x30   : > { %s2238_s26 = smov 4   ;;  %s2239_s25 = smov 64  }
  0x31   : > { %s437_s15 = scalar_lea.hbm %s2235_s1, %s1719_s21  ;;  %s1155_s29 = sshll.u32 %s1885_s12, 6 }
  0x32   : > { %s439_s16 = sshll.u32 %s437_s15, 4  ;;  %s1731_s9 = smov 8   ;;  %s440_s16 = int_to_ptr.hbm [resolvable:$true] %s439_s16 }
  0x33   : > { %1305 = dma.hbm_to_vmem [thread:$0]  (!%p1887_p9), %s440_s16, 16, %s442_s17, %s1897_s19  }
  0x34   : > { %s368_s22 = sshll.u32 %s2236_s4, 4  ;;  %s1729_s17 = smov [#allocation11]   ;;  %s369_s22 = int_to_ptr.hbm [resolvable:$true] %s368_s22 }
  0x35   : > { %s382_s1 = sshll.u32 %s2237_s5, 4  ;;  %s384_s11 = sshll.u32 %s1729_s17, 4  ;;  %s383_s1 = int_to_ptr.hbm [resolvable:$true] %s382_s1  ;;  %s385_s11 = int_to_ptr.vmem [resolvable:$true] %s384_s11 }
  0x36   : > { %1295 = dma.hbm_to_vmem [thread:$0]  (!%p1841_p5), %s369_s22, 512, %s371_s14, [#allocation9], %s2239_s25, %s2239_s25, %s2238_s26  }
  0x37   : > { %1298 = dma.hbm_to_vmem [thread:$0]  (!%p1841_p5), %s383_s1, 512, %s385_s11, [#allocation12], %s2239_s25, %s2239_s25, %s2238_s26  }
  0x38   : > { %s1237_s16 = sshll.u32 %s1719_s21, 6  ;;  %s411_s22 = scalar_lea.vmem [#allocation2], %s1155_s29 }
  0x39   : > { %s418_s28 = scalar_lea.hbm %s2186_s0, %s1237_s16  ;;  %s421_s14 = sshll.u32 %s411_s22, 4  ;;  %s422_s14 = int_to_ptr.vmem [resolvable:$true] %s421_s14 }
  0x3a   : > { %s419_s4 = sshll.u32 %s418_s28, 4  ;;  %s408_s17 = scalar_lea.sflag [#allocation3], %s1885_s12  ;;  %s420_s4 = int_to_ptr.hbm [resolvable:$true] %s419_s4 }
  0x3b   : > { %s1730_s5 = smov 128   ;;  %s454_s1 = scalar_lea.hbm %s2188_s2, %s1719_s21 }
  0x3c   : > { %1302 = dma.hbm_to_vmem [thread:$0]  (!%p1887_p9), %s420_s4, 1024, %s422_s14, %s408_s17, %s1730_s5, %s1730_s5, %s1731_s9  }
  0x3d   : > { %s451_s26 = scalar_lea.vmem [#allocation7], %s1885_s12  ;;  %s456_s11 = sshll.u32 %s454_s1, 4  ;;  %s457_s11 = int_to_ptr.hbm [resolvable:$true] %s456_s11 }
  0x3e   : > { %s458_s25 = sshll.u32 %s451_s26, 4  ;;  %467 = sbr.rel (%p1833_p3) target bundleno = 298 (0x12a), region = 56  ;;  %s459_s25 = int_to_ptr.vmem [resolvable:$true] %s458_s25 }
  0x3f   : > { %1308 = dma.hbm_to_vmem [thread:$0]  (!%p1887_p9), %s457_s11, 16, %s459_s25, %s1897_s19  }
  0x40   : > { %s1937_s29 = sand.u32 (!%p1833_p3), 1, %s1707_s18  }
  0x41   : > { %s1159_s4 = sshll.u32 (!%p1833_p3), %s1937_s29, 6  ;;  %s470_s5 = scalar_lea.sflag (!%p1833_p3), [#allocation3], %s1937_s29 }
  0x42   : > { %s1941_s9 = scalar_lea.vmem (!%p1833_p3), [#allocation2], %s1159_s4 }
  0x43   : > { %1678 = dma.done.wait (%p1863_p12), %s470_s5, 1024  }
  0x44   : > { %1680 = vsyncadd (%p1863_p12), %s470_s5, 4294966272  ;;  %s479_s10 = sand.u32 1, %s1825_s23   ;;  %s482_s27 = scalar_lea.vmem [#allocation5], %s1937_s29 }
  0x45   : > { %s480_s19 = scalar_lea.sflag [#allocation6], %s479_s10 }
  0x46   : > { %1682 = dma.done.wait (%p1863_p12), %s480_s19, 32  }
  0x47   : > { %1684 = vsyncadd (%p1863_p12), %s480_s19, 4294967264  ;;  %s491_s12 = scalar_lea.vmem [#allocation7], %s1937_s29 }
  0x48   : > { %1686 = dma.done.wait (%p71_p1), [#allocation9], 1024  }
  0x49   : > { %1688 = vsyncadd (%p71_p1), [#allocation9], 4294966272 }
  0x4a   : > { %1690 = dma.done.wait (%p71_p1), [#allocation12], 512  }
  0x4b   : > { %1692 = vsyncadd (%p71_p1), [#allocation12], 4294966784  ;;  %v1241_v0 = vld [vmem:[#allocation8 + $0x18] sm:$0xff]  ;;  %v1240_v3 = vld [vmem:[#allocation8 + $0x10] sm:$0xff]  ;;  %vm641_vm0 = vcmask 523264   ;;  %s1163_s15 = sshll.u32 %s1937_s29, 5 }
  0x4c   : > { %v1245_v1 = vld [vmem:[#allocation10 + $0x18] sm:$0xff]  ;;  %658 = vmatpush.bf16.msra.mxu0 %v1241_v0  ;;  %1253 = vmatpush.bf16.msra.mxu3 %v1241_v0  ;;  %v1244_v4 = vld [vmem:[#allocation10 + $0x10] sm:$0xff]  ;;  %v1239_v6 = vld [vmem:[#allocation8 + $0x8] sm:$0xff]  ;;  %vm691_vm1 = vcmask 519168   ;;  %s2002_s14 = scalar_lea.vmem [#allocation13], %s1163_s15  ;;  %s2006_s17 = scalar_lea.vmem [#allocation14], %s1163_s15 }
  0x4d   : > { %v1249_v2 = vld [vmem:[#allocation11 + $0x18] sm:$0xff]  ;;  %1257 = vmatpush.bf16.msra.mxu1 %v1245_v1  ;;  %v1248_v5 = vld [vmem:[#allocation11 + $0x10] sm:$0xff]  ;;  %v570_v8 = vld [vmem:[%s1941_s9 + $0x8] sm:$0xff]  ;;  %s2016_s30 = scalar_lea.vmem [#allocation16], %s1163_s15  ;;  %s2055_s1 = sshll.u32 %s1715_s20, 5 }
  0x4e   : > { %1261 = vmatpush.bf16.msra.mxu2 %v1249_v2  ;;  %v569_v7 = vld [vmem:[%s1941_s9] sm:$0xff]  ;;  %v1243_v11 = vld [vmem:[#allocation10 + $0x8] sm:$0xff]  ;;  %v572_v13 = vld [vmem:[%s1941_s9 + $0x18] sm:$0xff]  ;;  %s2240_s11 = sld [smem:[#allocation35_spill]]  ;;  %s906_s20 = sshll.u32 %s2006_s17, 4  ;;  %s2082_s20 = int_to_ptr.vmem [resolvable:$true] %s906_s20 }
  0x4f   : > { %v1384_v9 = vld [vmem:[%s482_s27] ss:$0 sm:$0xff]  ;;  %v571_v12 = vld [vmem:[%s1941_s9 + $0x10] sm:$0xff]  ;;  %v1238_v22 = vld [vmem:[#allocation8] sm:$0xff]  ;;  %s2241_s27 = sld [smem:[#allocation34_spill]]  ;;  %s887_s28 = sshll.u32 %s2002_s14, 4  ;;  %s888_s28 = int_to_ptr.vmem [resolvable:$true] %s887_s28 }
  0x50   : > { %v1385_v10 = vld [vmem:[%s491_s12] ss:$0 sm:$0xff]  ;;  %659 = vmatpush.bf16.msra.mxu0 %v1240_v3  ;;  %1254 = vmatpush.bf16.msra.mxu3 %v1240_v3  ;;  %v1247_v14 = vld [vmem:[#allocation11 + $0x8] sm:$0xff]  ;;  %v581_v15 = vmul.f32 %v1384_v9, %v569_v7  ;;  %v582_v16 = vmul.f32 %v1384_v9, %v570_v8  ;;  %v583_v17 = vmul.f32 %v1384_v9, %v571_v12  ;;  %v1242_v24 = vld [vmem:[#allocation10] sm:$0xff]  ;;  %s2243_s3 = sld [smem:[#allocation36_spill]]  ;;  %s2099_s26 = scalar_lea.sflag [#allocation15], %s479_s10 }
  0x51   : > { %1258 = vmatpush.bf16.msra.mxu1 %v1244_v4  ;;  %v584_v18 = vmul.f32 %v1384_v9, %v572_v13  ;;  %v1246_v25 = vld [vmem:[#allocation11] sm:$0xff]  ;;  %v575_v35 = vld [vmem:[%s1941_s9 + $0x30] sm:$0xff]  ;;  %v576_v36 = vld [vmem:[%s1941_s9 + $0x38] sm:$0xff] }
  0x52   : > { %1262 = vmatpush.bf16.msra.mxu2 %v1248_v5  ;;  %v593_v19 = vadd.f32 %v1385_v10, %v581_v15  ;;  %v594_v20 = vadd.f32 %v1385_v10, %v582_v16  ;;  %v595_v21 = vadd.f32 %v1385_v10, %v583_v17  ;;  %v573_v28 = vld [vmem:[%s1941_s9 + $0x20] sm:$0xff]  ;;  %v574_v29 = vld [vmem:[%s1941_s9 + $0x28] sm:$0xff]  ;;  %v587_v37 = vmul.f32 %v1384_v9, %v575_v35 }
  0x53   : > { %v596_v23 = vadd.f32 %v1385_v10, %v584_v18  ;;  %v585_v30 = vmul.f32 %v1384_v9, %v573_v28  ;;  %v586_v31 = vmul.f32 %v1384_v9, %v574_v29  ;;  %v588_v38 = vmul.f32 %v1384_v9, %v576_v36  ;;  %v1987_v42 = vld [vmem:[%s2192_s6] ss:$0 sm:$0xff] }
  0x54   : > { %660 = vmatpush.bf16.msra.mxu0 %v1239_v6  ;;  %1255 = vmatpush.bf16.msra.mxu3 %v1239_v6  ;;  %v601_v26 = vpack.c.bf16 %v594_v20, %v593_v19  ;;  %v599_v39 = vadd.f32 %v1385_v10, %v587_v37  ;;  %v1992_v43 = vld [vmem:[%s2193_s7] ss:$0 sm:$0xff]  ;;  %s905_s4 = scalar_lea.hbm %s2240_s11, %s2055_s1 }
  0x55   : > { %1259 = vmatpush.bf16.msra.mxu1 %v1243_v11  ;;  %v602_v27 = vpack.c.bf16 %v596_v23, %v595_v21  ;;  %v597_v32 = vadd.f32 %v1385_v10, %v585_v30  ;;  %v598_v33 = vadd.f32 %v1385_v10, %v586_v31  ;;  %v600_v40 = vadd.f32 %v1385_v10, %v588_v38  ;;  %v2000_v50 = vld [vmem:[%s2194_s8] ss:$0 sm:$0xff]  ;;  %s2071_s5 = sshll.u32 %s905_s4, 4  ;;  %s886_s12 = scalar_lea.hbm %s2241_s27, %s2055_s1  ;;  %s909_s5 = int_to_ptr.hbm [resolvable:$true] %s2071_s5 }
  0x56   : > { %1263 = vmatpush.bf16.msra.mxu2 %v1247_v14  ;;  %s924_s15 = scalar_lea.hbm %s2243_s3, %s2055_s1  ;;  %s2094_s22 = sshll.u32 %s886_s12, 4  ;;  %s890_s22 = int_to_ptr.hbm [resolvable:$true] %s2094_s22 }
  0x57   : > { %v603_v34 = vpack.c.bf16 %v598_v33, %v597_v32  ;;  %v604_v41 = vpack.c.bf16 %v600_v40, %v599_v39  ;;  %s1583_s25 = sshra.s32 %s909_s5, 4  ;;  %s1584_s25 = int_to_ptr.hbm [resolvable:$true] %s1583_s25 }
  0x58   : > { %661 = vmatpush.bf16.msra.mxu0 %v1238_v22  ;;  %1256 = vmatpush.bf16.msra.mxu3 %v1238_v22  ;;  %s1585_s4 = scalar_lea.hbm %s1584_s25, 32  ;;  %p1590_p6 = scmp.lt.s32.totalorder %s1584_s25, %s2240_s11 }
  0x59   : > { %1260 = vmatpush.bf16.msra.mxu1 %v1242_v24  ;;  %p1586_p1 = scmp.ne.s32.totalorder %s1584_s25, %s1585_s4 }
  0x5a   : > { %1264 = vmatpush.bf16.msra.mxu2 %v1246_v25 }
  0x5b   : > { %1182 = vmatmul.msk.bf16.vlgmr.msra.gmra.mxu0 %vm641_vm0, %v601_v26  ;;  %1183 = vmatmul.msk.bf16.vlgmr.msra.gmra.mxu3 %vm641_vm0, %v602_v27  ;;  %p1587_p3 = pnand %p1586_p1, %p1872_p4 }
  0x5c   : > { %740 = vmatpush.bf16.msrb.mxu0 %v1245_v1  ;;  %1203 = vmatmul.msk.bf16.vlgmr.msra.gmra.mxu1 %vm641_vm0, %v602_v27 }
  0x5d   : > { %1223 = vmatmul.msk.bf16.vlgmr.msra.gmra.mxu2 %vm641_vm0, %v602_v27  ;;  %p1588_p5 = pneg %p1587_p3 }
  0x60   : > { %741 = vmatpush.bf16.msrb.mxu0 %v1244_v4 }
  0x64   : > { %742 = vmatpush.bf16.msrb.mxu0 %v1243_v11 }
  0x68   : > { %743 = vmatpush.bf16.msrb.mxu0 %v1242_v24 }
  0x6b   : > { %1184 = vmatmul.msk.bf16.gmra.mxu3 %vm641_vm0, %v603_v34  ;;  %1202 = vmatmul.msk.bf16.vlgmr.msrb.gmra.mxu0 %vm641_vm0, %v601_v26 }
  0x6c   : > { %821 = vmatpush.bf16.msra.mxu0 %v1249_v2  ;;  %1204 = vmatmul.msk.bf16.gmra.mxu1 %vm641_vm0, %v603_v34 }
  0x6d   : > { %1224 = vmatmul.msk.bf16.gmra.mxu2 %vm641_vm0, %v603_v34 }
  0x70   : > { %822 = vmatpush.bf16.msra.mxu0 %v1248_v5 }
  0x74   : > { %823 = vmatpush.bf16.msra.mxu0 %v1247_v14 }
  0x78   : > { %824 = vmatpush.bf16.msra.mxu0 %v1246_v25 }
  0x7b   : > { %1185 = vmatmul.msk.bf16.gmra.mxu3 %vm641_vm0, %v604_v41  ;;  %1222 = vmatmul.msk.bf16.vlgmr.msra.gmra.mxu0 %vm641_vm0, %v601_v26 }
  0x7c   : > { %1205 = vmatmul.msk.bf16.gmra.mxu1 %vm641_vm0, %v604_v41 }
  0x7d   : > { %1225 = vmatmul.msk.bf16.gmra.mxu2 %vm641_vm0, %v604_v41 }
  0xd8   : > { %v663_v44 = vpop.f32.mrf.mxu0 }
  0xd9   : > { %v664_v45 = vadd.f32 %v1987_v42, %v663_v44  ;;  %v750_v46 = vpop.f32.mrf.mxu1 }
  0xda   : > { %v751_v47 = vadd.f32 %v1992_v43, %v750_v46 }
  0xdb   : > { %v683_v48 = vpack.c.bf16 %v664_v45, %v664_v45 }
  0xdc   : > { %v767_v49 = vpack.c.bf16 %v751_v47, %v751_v47 }
  0xdd   : > { %692 = vst.msk [vmem:[%s2002_s14] sm:$0xf] %vm691_vm1, %v683_v48 }
  0xde   : > { %775 = vst.msk [vmem:[%s2006_s17 + $0x8] sm:$0xf] %vm691_vm1, %v767_v49  ;;  %v668_v51 = vpop.f32.mrf.mxu3 }
  0xdf   : > { %v669_v52 = vadd.f32 %v1987_v42, %v668_v51 }
  0xe0   : > { %v831_v53 = vpop.f32.mrf.mxu2  ;;  %v665_v55 = vpop.f32.mrf.mxu0 }
  0xe1   : > { %v832_v54 = vadd.f32 %v2000_v50, %v831_v53  ;;  %v685_v56 = vpack.c.bf16 %v669_v52, %v669_v52  ;;  %v666_v57 = vadd.f32 %v1987_v42, %v665_v55  ;;  %v752_v58 = vpop.f32.mrf.mxu1 }
  0xe2   : > { %v753_v60 = vadd.f32 %v1992_v43, %v752_v58 }
  0xe3   : > { %v848_v59 = vpack.c.bf16 %v832_v54, %v832_v54  ;;  %694 = vst.msk [vmem:[%s2002_s14 + $0x8] sm:$0xf] %vm691_vm1, %v685_v56  ;;  %v684_v61 = vpack.c.bf16 %v666_v57, %v666_v57 }
  0xe4   : > { %v768_v62 = vpack.c.bf16 %v753_v60, %v753_v60 }
  0xe5   : > { %856 = vst.msk [vmem:[%s2016_s30 + $0x8] sm:$0xf] %vm691_vm1, %v848_v59 }
  0xe6   : > { %693 = vst.msk [vmem:[%s2002_s14 + $0x4] sm:$0xf] %vm691_vm1, %v684_v61  ;;  %v670_v63 = vpop.f32.mrf.mxu3 }
  0xe7   : > { %776 = vst.msk [vmem:[%s2006_s17 + $0xc] sm:$0xf] %vm691_vm1, %v768_v62  ;;  %v671_v0 = vadd.f32 %v1987_v42, %v670_v63 }
  0xe8   : > { %v833_v1 = vpop.f32.mrf.mxu2  ;;  %v745_v3 = vpop.f32.mrf.mxu0 }
  0xe9   : > { %v834_v2 = vadd.f32 %v2000_v50, %v833_v1  ;;  %v686_v4 = vpack.c.bf16 %v671_v0, %v671_v0  ;;  %v746_v5 = vadd.f32 %v1992_v43, %v745_v3  ;;  %v755_v6 = vpop.f32.mrf.mxu1 }
  0xea   : > { %v756_v8 = vadd.f32 %v1992_v43, %v755_v6 }
  0xeb   : > { %v849_v7 = vpack.c.bf16 %v834_v2, %v834_v2  ;;  %695 = vst.msk [vmem:[%s2002_s14 + $0xc] sm:$0xf] %vm691_vm1, %v686_v4  ;;  %v765_v9 = vpack.c.bf16 %v746_v5, %v746_v5 }
  0xec   : > { %v769_v10 = vpack.c.bf16 %v756_v8, %v756_v8 }
  0xed   : > { %857 = vst.msk [vmem:[%s2016_s30 + $0xc] sm:$0xf] %vm691_vm1, %v849_v7 }
  0xee   : > { %773 = vst.msk [vmem:[%s2006_s17] sm:$0xf] %vm691_vm1, %v765_v9  ;;  %v673_v11 = vpop.f32.mrf.mxu3 }
  0xef   : > { %777 = vst.msk [vmem:[%s2006_s17 + $0x10] sm:$0xf] %vm691_vm1, %v769_v10  ;;  %v674_v12 = vadd.f32 %v1987_v42, %v673_v11 }
  0xf0   : > { %v836_v13 = vpop.f32.mrf.mxu2  ;;  %v747_v15 = vpop.f32.mrf.mxu0 }
  0xf1   : > { %v837_v14 = vadd.f32 %v2000_v50, %v836_v13  ;;  %v687_v16 = vpack.c.bf16 %v674_v12, %v674_v12  ;;  %v748_v17 = vadd.f32 %v1992_v43, %v747_v15  ;;  %v757_v18 = vpop.f32.mrf.mxu1 }
  0xf2   : > { %v758_v20 = vadd.f32 %v1992_v43, %v757_v18 }
  0xf3   : > { %v850_v19 = vpack.c.bf16 %v837_v14, %v837_v14  ;;  %696 = vst.msk [vmem:[%s2002_s14 + $0x10] sm:$0xf] %vm691_vm1, %v687_v16  ;;  %v766_v21 = vpack.c.bf16 %v748_v17, %v748_v17 }
  0xf4   : > { %v770_v22 = vpack.c.bf16 %v758_v20, %v758_v20 }
  0xf5   : > { %858 = vst.msk [vmem:[%s2016_s30 + $0x10] sm:$0xf] %vm691_vm1, %v850_v19 }
  0xf6   : > { %774 = vst.msk [vmem:[%s2006_s17 + $0x4] sm:$0xf] %vm691_vm1, %v766_v21  ;;  %v675_v23 = vpop.f32.mrf.mxu3 }
  0xf7   : > { %778 = vst.msk [vmem:[%s2006_s17 + $0x14] sm:$0xf] %vm691_vm1, %v770_v22  ;;  %v676_v24 = vadd.f32 %v1987_v42, %v675_v23 }
  0xf8   : > { %v838_v25 = vpop.f32.mrf.mxu2  ;;  %v826_v27 = vpop.f32.mrf.mxu0 }
  0xf9   : > { %v839_v26 = vadd.f32 %v2000_v50, %v838_v25  ;;  %v688_v28 = vpack.c.bf16 %v676_v24, %v676_v24  ;;  %v760_v29 = vpop.f32.mrf.mxu1  ;;  %v827_v30 = vadd.f32 %v2000_v50, %v826_v27 }
  0xfa   : > { %v761_v32 = vadd.f32 %v1992_v43, %v760_v29 }
  0xfb   : > { %v851_v31 = vpack.c.bf16 %v839_v26, %v839_v26  ;;  %697 = vst.msk [vmem:[%s2002_s14 + $0x14] sm:$0xf] %vm691_vm1, %v688_v28  ;;  %v846_v33 = vpack.c.bf16 %v827_v30, %v827_v30 }
  0xfc   : > { %v771_v34 = vpack.c.bf16 %v761_v32, %v761_v32 }
  0xfd   : > { %859 = vst.msk [vmem:[%s2016_s30 + $0x14] sm:$0xf] %vm691_vm1, %v851_v31 }
  0xfe   : > { %854 = vst.msk [vmem:[%s2016_s30] sm:$0xf] %vm691_vm1, %v846_v33  ;;  %v678_v35 = vpop.f32.mrf.mxu3 }
  0xff   : > { %779 = vst.msk [vmem:[%s2006_s17 + $0x18] sm:$0xf] %vm691_vm1, %v771_v34  ;;  %v679_v36 = vadd.f32 %v1987_v42, %v678_v35 }
 0x100   : > { %v841_v37 = vpop.f32.mrf.mxu2  ;;  %v828_v39 = vpop.f32.mrf.mxu0 }
 0x101   : > { %v842_v38 = vadd.f32 %v2000_v50, %v841_v37  ;;  %v689_v40 = vpack.c.bf16 %v679_v36, %v679_v36  ;;  %v762_v41 = vpop.f32.mrf.mxu1  ;;  %v829_v44 = vadd.f32 %v2000_v50, %v828_v39 }
 0x102   : > { %v763_v46 = vadd.f32 %v1992_v43, %v762_v41 }
 0x103   : > { %v852_v45 = vpack.c.bf16 %v842_v38, %v842_v38  ;;  %698 = vst.msk [vmem:[%s2002_s14 + $0x18] sm:$0xf] %vm691_vm1, %v689_v40  ;;  %v847_v47 = vpack.c.bf16 %v829_v44, %v829_v44 }
 0x104   : > { %v772_v48 = vpack.c.bf16 %v763_v46, %v763_v46 }
 0x105   : > { %860 = vst.msk [vmem:[%s2016_s30 + $0x18] sm:$0xf] %vm691_vm1, %v852_v45 }
 0x106   : > { %855 = vst.msk [vmem:[%s2016_s30 + $0x4] sm:$0xf] %vm691_vm1, %v847_v47  ;;  %v680_v43 = vpop.f32.mrf.mxu3 }
 0x107   : > { %780 = vst.msk [vmem:[%s2006_s17 + $0x1c] sm:$0xf] %vm691_vm1, %v772_v48  ;;  %v681_v49 = vadd.f32 %v1987_v42, %v680_v43  ;;  %s1589_s17 = scalar_lea.hbm %s2240_s11, 64 }
 0x108   : > { %v843_v51 = vpop.f32.mrf.mxu2  ;;  %p1591_p8 = scmp.lt.s32.totalorder %s1589_s17, %s1585_s4 }
 0x10a   : > { %p1592_p10 = por %p1591_p8, %p1590_p6 }
 0x10c   : > { %p1593_p11 = pnand %p1592_p10, %p1588_p5 }
 0x10e   : > { %1596 = shalt.err (!%p1593_p11)
}
 0x10f   : > { %s1732_s23 = smov 64   ;;  %s1733_s10 = smov 4   ;;  %v844_v42 = vadd.f32 %v2000_v50, %v843_v51  ;;  %v690_v52 = vpack.c.bf16 %v681_v49, %v681_v49 }
 0x110   : > { %1284 = dma.vmem_to_hbm [thread:$0]  (%p1872_p4), %s2082_s20, 512, %s909_s5, %s2099_s26, %s1732_s23, %s1732_s23, %s1733_s10  }
 0x111   : > { %s925_s24 = sshll.u32 %s2016_s30, 4  ;;  %s2118_s16 = sshll.u32 %s924_s15, 4  ;;  %v853_v53 = vpack.c.bf16 %v844_v42, %v844_v42  ;;  %699 = vst.msk [vmem:[%s2002_s14 + $0x1c] sm:$0xf] %vm691_vm1, %v690_v52  ;;  %s2121_s24 = int_to_ptr.vmem [resolvable:$true] %s925_s24  ;;  %s928_s16 = int_to_ptr.hbm [resolvable:$true] %s2118_s16 }
 0x112   : > { %s863_s25 = scalar_lea.sflag [#allocation4], %s1937_s29  ;;  %s1611_s20 = sshra.s32 %s890_s22, 4  ;;  %s1612_s20 = int_to_ptr.hbm [resolvable:$true] %s1611_s20 }
 0x113   : > { %861 = vst.msk [vmem:[%s2016_s30 + $0x1c] sm:$0xf] %vm691_vm1, %v853_v53  ;;  %s1613_s5 = scalar_lea.hbm %s1612_s20, 32  ;;  %s1617_s1 = scalar_lea.hbm %s2241_s27, 64 }
 0x114   : > { %p1614_p12 = scmp.ne.s32.totalorder %s1612_s20, %s1613_s5  ;;  %p1618_p2 = scmp.lt.s32.totalorder %s1612_s20, %s2241_s27 }
 0x115   : > { %p1619_p9 = scmp.lt.s32.totalorder %s1617_s1, %s1613_s5 }
 0x116   : > { %p1615_p13 = pnand %p1614_p12, %p1872_p4 }
 0x117   : > { %p1620_p1 = por %p1619_p9, %p1618_p2 }
 0x118   : > { %p1616_p0 = pneg %p1615_p13 }
 0x11a   : > { %p1621_p3 = pnand %p1620_p1, %p1616_p0 }
 0x11c   : > { %1624 = shalt.err (!%p1621_p3)
}
 0x11d   : > { %1283 = dma.vmem_to_hbm [thread:$0]  (%p1872_p4), %s888_s28, 512, %s890_s22, %s863_s25, %s1732_s23, %s1732_s23, %s1733_s10  }
 0x11e   : > { %s1639_s29 = sshra.s32 %s928_s16, 4  ;;  %s1645_s12 = scalar_lea.hbm %s2243_s3, 64  ;;  %s1640_s29 = int_to_ptr.hbm [resolvable:$true] %s1639_s29 }
 0x11f   : > { %s1641_s14 = scalar_lea.hbm %s1640_s29, 32  ;;  %p1646_p10 = scmp.lt.s32.totalorder %s1640_s29, %s2243_s3 }
 0x120   : > { %p1642_p5 = scmp.ne.s32.totalorder %s1640_s29, %s1641_s14  ;;  %p1647_p11 = scmp.lt.s32.totalorder %s1645_s12, %s1641_s14 }
 0x122   : > { %p1643_p6 = pnand %p1642_p5, %p1872_p4  ;;  %p1648_p12 = por %p1647_p11, %p1646_p10 }
 0x124   : > { %p1644_p8 = pneg %p1643_p6 }
 0x126   : > { %p1649_p13 = pnand %p1648_p12, %p1644_p8 }
 0x128   : > { %1652 = shalt.err (!%p1649_p13)
}
 0x129   : > { %1285 = dma.vmem_to_hbm [thread:$0]  (%p1872_p4), %s2121_s24, 512, %s928_s16, %s2099_s26, %s1732_s23, %s1732_s23, %s1733_s10  }
 0x12a PF: > { %s2244_s28 = sld [smem:[#allocation23_spill]] }
 0x12b   : > { %s2246_s25 = sld [smem:[#allocation25_spill]] }
 0x130   : > { %s942_s15 = sand.u32 1, %s2244_s28  }
 0x131   : > { %p2247_p0 = scmp.ge.s32.totalorder %s2246_s25, 2  ;;  %s943_s4 = scalar_lea.sflag [#allocation4], %s942_s15 }
 0x133   : > { %p1310_p2 = pnand %p2247_p0, %p1880_p7 }
 0x135   : > { %p1311_p9 = pneg %p1310_p2 }
 0x137   : > { %1694 = dma.done.wait (%p1311_p9), %s943_s4, 512  }
 0x138   : > { %1696 = vsyncadd (%p1311_p9), %s943_s4, 4294966784  ;;  %s2248_s13 = sadd.s32 4294967294, %s2246_s25  }
 0x139   : > { %s952_s1 = sand.u32 1, %s2248_s13  }
 0x13a   : > { %s953_s9 = scalar_lea.sflag [#allocation15], %s952_s1 }
 0x13b   : > { %1698 = dma.done.wait (%p1311_p9), %s953_s9, 1024  }
 0x13c   : > { %1700 = vsyncadd (%p1311_p9), %s953_s9, 4294966272  ;;  %s36_s22 = sadd.s32 1, %s2246_s25   ;;  %s2249_s26 = sld [smem:[#allocation24_spill]] }
 0x13d   : > { %p33_p4 = scmp.ge.s32.totalorder %s36_s22, 4   ;;  %s2250_s19 = sld [smem:[#allocation28_spill]] }
 0x13e   : > { %s2251_s23 = sld [smem:[#allocation26_spill]]  ;;  %s2252_s17 = smov %s1707_s18 }
 0x13f   : > { %s2254_s20 = smov %s1719_s21 }
 0x140   :  { %35 = sbr.rel (!%p33_p4) target bundleno = 20 (0x14), region = 169 }
 0x142   : > { %s2253_s18 = smov %s2249_s26 }
 0x144   : > { %s2255_s21 = smov %s2251_s23 }
 0x145   :  { %969 = vsyncpa [#allocation3], 1 }
 0x146   :  { %971 = vsyncpa [#allocation3 + $0x1], 1 }
 0x147   :  { %972 = vsyncpa [#allocation6], 1 }
 0x148   :  { %974 = vsyncpa [#allocation6 + $0x1], 1 }
 0x149   :  { %975 = vsyncpa [#allocation9], 1 }
 0x14a   :  { %976 = vsyncpa [#allocation12], 1 }
 0x14b   :  { %977 = vsyncpa [#allocation4], 1 }
 0x14c   :  { %979 = vsyncpa [#allocation4 + $0x1], 1 }
 0x14d   :  { %980 = vsyncpa [#allocation15], 1 }
 0x14e   :  { %982 = vsyncpa [#allocation15 + $0x1], 1 }

</bundles_post_ra>
